<compile_context>
chip_gen: v7x
topology: tpu7x:2x2x1
jax: 0.10.0
libtpu: 0.0.40
codegen_flags: <defaults>
</compile_context>

<pallas_src>
import jax
import jax.numpy as jnp
from jax import lax
from jax.experimental import pallas as pl
from jax.experimental.pallas import tpu as pltpu

TEMPERATURE = 2.0

# Lane-dense geometry for the feature-MSE sweep.
FEAT_LANES = 512                    # multiple of 128 -> unmasked full-width vld/vst
FEAT_MAX_TILE_ROWS = 2048           # 2048x512 f32 = 4 MiB / input block
FEAT_GRAN = 8 * FEAT_LANES          # minimal zero-pad granularity (16 KiB), not 1 MiB
MSE_VMEM_LIMIT = 40 * 1024 * 1024   # 16 MiB buffered inputs + headroom; <= v7x physical
KL_VMEM_LIMIT = 40 * 1024 * 1024


def _round_up(x, m):
    return ((x + m - 1) // m) * m


# ---------------------------------------------------------------------------
# Kernel 1: per-feature squared-difference partial sums.
# Each grid step streams one (tile_rows, FEAT_LANES) block of both features,
# accumulates (s - t)^2 into an (8, FEAT_LANES) vector with a fori_loop, and
# writes a grid-indexed partial-sum block.  Grid axis is "parallel" so both
# v7x TensorCores split the HBM sweep; the tiny final reduction happens in
# the wrapper on a few KB.
# ---------------------------------------------------------------------------
def _make_sq_diff_kernel(tile_rows, rows_total, needs_mask):
    n_chunks = tile_rows // 8

    def kernel(s_ref, t_ref, o_ref):
        block_base = pl.program_id(0) * tile_rows

        def body(k, acc):
            start = pl.multiple_of(k * 8, 8)
            d = (s_ref[pl.ds(start, 8), :].astype(jnp.float32)
                 - t_ref[pl.ds(start, 8), :].astype(jnp.float32))
            dd = d * d
            if needs_mask:
                # Only the last grid block can read past the array (garbage
                # rows in the boundary block); zero them out.
                row = (block_base + start
                       + lax.broadcasted_iota(jnp.int32, (8, 1), 0))
                dd = jnp.where(row < rows_total, dd, 0.0)
            return acc + dd

        o_ref[...] = lax.fori_loop(
            0, n_chunks, body,
            jnp.zeros((8, FEAT_LANES), jnp.float32),
            unroll=min(8, n_chunks),
        )

    return kernel


def _feature_sq_diff_sum(s_feat, t_feat):
    """sum((s - t)**2) over one feature pair via a lane-dense Pallas sweep."""
    assert s_feat.shape == t_feat.shape
    n = s_feat.size
    s_flat = s_feat.reshape(-1)
    t_flat = t_feat.reshape(-1)

    # Pad only the tail to an (8, FEAT_LANES) granule (16 KiB); skipped when
    # already aligned (the common case for conv feature maps) so no extra
    # HBM copy.  Zero pads contribute exactly 0 to the squared-diff sum.
    padded_n = _round_up(n, FEAT_GRAN)
    if padded_n != n:
        s_flat = jnp.pad(s_flat, (0, padded_n - n))
        t_flat = jnp.pad(t_flat, (0, padded_n - n))

    rows = padded_n // FEAT_LANES                 # multiple of 8, >= 8
    tile_rows = min(FEAT_MAX_TILE_ROWS, rows)
    grid_n = pl.cdiv(rows, tile_rows)
    needs_mask = (rows % tile_rows) != 0          # boundary block -> mask garbage

    s2d = s_flat.reshape(rows, FEAT_LANES)
    t2d = t_flat.reshape(rows, FEAT_LANES)

    partials = pl.pallas_call(
        _make_sq_diff_kernel(tile_rows, rows, needs_mask),
        out_shape=jax.ShapeDtypeStruct((grid_n * 8, FEAT_LANES), jnp.float32),
        grid=(grid_n,),
        in_specs=[
            pl.BlockSpec((tile_rows, FEAT_LANES), lambda i: (i, 0)),
            pl.BlockSpec((tile_rows, FEAT_LANES), lambda i: (i, 0)),
        ],
        out_specs=pl.BlockSpec((8, FEAT_LANES), lambda i: (i, 0)),
        compiler_params=pltpu.CompilerParams(
            dimension_semantics=("parallel",),
            vmem_limit_bytes=MSE_VMEM_LIMIT,
        ),
    )(s2d, t2d)

    return jnp.sum(partials), n


def feature_mse_loss_pallas(student_features, teacher_features):
    """mean_f[ F.mse_loss(s_f, t_f) ] - one pallas_call per feature pair."""
    assert len(student_features) == len(teacher_features) and student_features
    loss = jnp.float32(0.0)
    for s_feat, t_feat in zip(student_features, teacher_features):
        sq_sum, numel = _feature_sq_diff_sum(s_feat, t_feat)
        loss = loss + sq_sum / jnp.float32(numel)   # per-feature mean (F.mse_loss)
    return loss / jnp.float32(len(student_features))


# ---------------------------------------------------------------------------
# Kernel 2: KL(softmax(teacher/T) || softmax(student/T)), reduction='sum',
# as grid-indexed per-row partial sums (parallel grid -> both v7x cores).
# The 'batchmean' divide and the T**2 scale are scalar glue in the wrapper.
# ---------------------------------------------------------------------------
def _kl_partial_kernel(s_ref, t_ref, o_ref):
    inv_t = jnp.float32(1.0 / TEMPERATURE)
    s = s_ref[...].astype(jnp.float32) * inv_t
    t = t_ref[...].astype(jnp.float32) * inv_t

    # student log_softmax along the class (lane) dim; exp/log ride the EUP slot.
    s_max = jnp.max(s, axis=-1, keepdims=True)
    s_lse = jnp.log(jnp.sum(jnp.exp(s - s_max), axis=-1, keepdims=True)) + s_max
    s_logp = s - s_lse

    # teacher: reuse exp(t - t_max) for both the logsumexp and the probabilities
    # (saves one full-block transcendental vs. exp(t_logp)).
    t_max = jnp.max(t, axis=-1, keepdims=True)
    e_t = jnp.exp(t - t_max)
    sum_e_t = jnp.sum(e_t, axis=-1, keepdims=True)
    t_logp = (t - t_max) - jnp.log(sum_e_t)
    t_p = e_t * pl.reciprocal(sum_e_t, approx=False)   # per-row exact reciprocal

    # Per-row KL contribution; grid-indexed partial output (no cross-step race).
    o_ref[...] = jnp.sum(t_p * (t_logp - s_logp), axis=-1, keepdims=True)


def kl_output_loss_pallas(student_logits, teacher_logits, tb=512):
    assert student_logits.shape == teacher_logits.shape
    batch, n_classes = student_logits.shape

    # Lane-dense class dim: pad to a multiple of 128 with a large negative
    # *finite* value -> padded classes get exactly zero probability, no NaNs.
    cp = _round_up(n_classes, 128)
    if cp != n_classes:
        pad_c = cp - n_classes
        student_logits = jnp.pad(student_logits, ((0, 0), (0, pad_c)),
                                 constant_values=-1e9)
        teacher_logits = jnp.pad(teacher_logits, ((0, 0), (0, pad_c)),
                                 constant_values=-1e9)

    # VMEM guard (v7x has 64 MiB physical): cap each input block near 4 MiB so
    # 2 inputs x 2 pipeline buffers stay well inside the limit for large vocabs.
    # TODO(synk): for extreme vocabularies (cp f32 row > 4 MiB even at tb=8),
    # tile the class dim with an online logsumexp; not needed at these shapes.
    max_tb_vmem = max(8, ((4 * 1024 * 1024) // (cp * 4)) // 8 * 8)
    tb = max(8, min(tb, max_tb_vmem))

    padded_b = _round_up(batch, 8)
    tb = min(tb, padded_b)                 # tb is a multiple of 8 or == padded_b
    padded_b = _round_up(padded_b, tb)
    if padded_b != batch:
        pad = padded_b - batch
        # Zero rows are identical for student & teacher -> exactly 0 KL.
        student_logits = jnp.pad(student_logits, ((0, pad), (0, 0)))
        teacher_logits = jnp.pad(teacher_logits, ((0, pad), (0, 0)))
    nblocks = padded_b // tb

    row_kl = pl.pallas_call(
        _kl_partial_kernel,
        out_shape=jax.ShapeDtypeStruct((padded_b, 1), jnp.float32),
        grid=(nblocks,),
        in_specs=[
            pl.BlockSpec((tb, cp), lambda i: (i, 0)),
            pl.BlockSpec((tb, cp), lambda i: (i, 0)),
        ],
        out_specs=pl.BlockSpec((tb, 1), lambda i: (i, 0)),
        compiler_params=pltpu.CompilerParams(
            dimension_semantics=("parallel",),
            vmem_limit_bytes=KL_VMEM_LIMIT,
        ),
    )(student_logits, teacher_logits)

    # reduction='batchmean' divides by the original batch size; * T**2 scale.
    return jnp.sum(row_kl) / jnp.float32(batch) * jnp.float32(TEMPERATURE ** 2)


# ---------------------------------------------------------------------------
# Module wrapper mirroring DistillationLoss.forward.
# ---------------------------------------------------------------------------
class DistillationLoss:
    def __init__(self, distil_loss_weights=(0.5, 0.3, 0.2)):
        self.feature_weight = float(distil_loss_weights[0])
        self.output_weight = float(distil_loss_weights[1])
        self.task_weight = float(distil_loss_weights[2])
        self.temperature = TEMPERATURE

    def _compute_feature_loss(self, student_features, teacher_features):
        return feature_mse_loss_pallas(student_features, teacher_features)

    def _compute_output_loss(self, student_outputs, teacher_outputs):
        return kl_output_loss_pallas(student_outputs, teacher_outputs)

    def _compute_task_loss(self, outputs, targets):
        # TODO(synk): reference `_compute_detection_loss` is `pass` (returns None);
        # there is no detection-loss math to reproduce, so it contributes 0.0.
        return jnp.float32(0.0)

    def forward(self, student_outputs, teacher_outputs, targets):
        feature_loss = self._compute_feature_loss(
            student_outputs["features"], teacher_outputs["features"]
        )
        output_loss = self._compute_output_loss(
            student_outputs["outputs"], teacher_outputs["outputs"]
        )
        task_loss = self._compute_task_loss(student_outputs["outputs"], targets)
        total_loss = (
            self.feature_weight * feature_loss
            + self.output_weight * output_loss
            + self.task_weight * task_loss
        )
        # jnp scalars (not float()) so forward stays jit-compatible; call
        # float(...) on host to mirror `.item()`.
        return total_loss, {
            "feature_loss": feature_loss,
            "output_loss": output_loss,
            "task_loss": task_loss,
        }

    __call__ = forward


if __name__ == "__main__":
    key = jax.random.PRNGKey(0)
    ks = jax.random.split(key, 6)

    # Small shapes consistent with a detection distillation setup:
    # two feature-map pairs (NCHW) + per-image class logits.
    s_feat1 = jax.random.normal(ks[0], (2, 4, 16, 16), dtype=jnp.float32)
    t_feat1 = jax.random.normal(ks[1], (2, 4, 16, 16), dtype=jnp.float32)
    s_feat2 = jax.random.normal(ks[2], (2, 8, 8, 8), dtype=jnp.float32)
    t_feat2 = jax.random.normal(ks[3], (2, 8, 8, 8), dtype=jnp.float32)
    s_logits = jax.random.normal(ks[4], (2, 16), dtype=jnp.float32)
    t_logits = jax.random.normal(ks[5], (2, 16), dtype=jnp.float32)
    targets = jnp.zeros((2,), dtype=jnp.int32)  # unused (detection loss is a stub)

    student_outputs = {"features": [s_feat1, s_feat2], "outputs": s_logits}
    teacher_outputs = {"features": [t_feat1, t_feat2], "outputs": t_logits}

    loss_mod = DistillationLoss(distil_loss_weights=(0.5, 0.3, 0.2))
    total_loss, loss_dict = loss_mod(student_outputs, teacher_outputs, targets)
    total_loss = jax.block_until_ready(total_loss)

    # Cross-check against a pure-JAX reference (same math, no Pallas).
    def _ref():
        f = 0.0
        for s, t in zip(student_outputs["features"], teacher_outputs["features"]):
            f = f + jnp.mean((s - t) ** 2)
        f = f / 2.0
        sl = s_logits / TEMPERATURE
        tl = t_logits / TEMPERATURE
        s_logp = jax.nn.log_softmax(sl, axis=-1)
        t_logp = jax.nn.log_softmax(tl, axis=-1)
        t_p = jnp.exp(t_logp)
        kl = jnp.sum(t_p * (t_logp - s_logp)) / s_logits.shape[0] * TEMPERATURE ** 2
        return 0.5 * f + 0.3 * kl + 0.2 * 0.0

    ref_total = _ref()
    assert jnp.allclose(total_loss, ref_total, rtol=1e-5, atol=1e-5), (
        total_loss,
        ref_total,
    )
    print("KERNEL_OK")
</pallas_src>

<mosaic_0001>
module attributes {stable_mosaic.version = 11 : i64} {
  func.func @kernel(%arg0: i32, %arg1: memref<8x512xf32, #tpu.memory_space<vmem>>, %arg2: memref<8x512xf32, #tpu.memory_space<vmem>>, %arg3: memref<8x512xf32, #tpu.memory_space<vmem>>) attributes {dimension_semantics = [#tpu.dimension_semantics<parallel>], iteration_bounds = array<i64: 1>, scalar_prefetch = 0 : i64, scratch_operands = 0 : i64, tpu.core_type = #tpu.core_type<tc>, window_params = [{transform_indices = @transform_0, window_bounds = array<i64: 8, 512>}, {transform_indices = @transform_1, window_bounds = array<i64: 8, 512>}, {transform_indices = @transform_2, window_bounds = array<i64: 8, 512>}]} {
    %cst = arith.constant 0.000000e+00 : f32
    %0 = vector.broadcast %cst : f32 to vector<8x512xf32>
    %c0_i32 = arith.constant 0 : i32
    %c8_i32 = arith.constant 8 : i32
    %1 = arith.muli %c0_i32, %c8_i32 : i32
    %2 = tpu.assume_multiple %1, 8 : i32
    %3 = arith.index_cast %2 : i32 to index
    %c0 = arith.constant 0 : index
    %4 = vector.load %arg1[%3, %c0] : memref<8x512xf32, #tpu.memory_space<vmem>>, vector<8x512xf32>
    %5 = arith.index_cast %2 : i32 to index
    %c0_0 = arith.constant 0 : index
    %6 = vector.load %arg2[%5, %c0_0] : memref<8x512xf32, #tpu.memory_space<vmem>>, vector<8x512xf32>
    %7 = arith.subf %4, %6 : vector<8x512xf32>
    %8 = arith.mulf %7, %7 : vector<8x512xf32>
    %9 = arith.addf %0, %8 : vector<8x512xf32>
    %c1_i32 = arith.constant 1 : i32
    %c0_1 = arith.constant 0 : index
    %c0_2 = arith.constant 0 : index
    %10 = vector.load %arg3[%c0_1, %c0_2] : memref<8x512xf32, #tpu.memory_space<vmem>>, vector<8x512xf32>
    tpu.vector_store %arg3[%c0_1, %c0_2], %9 {strides = array<i32>} : memref<8x512xf32, #tpu.memory_space<vmem>>, vector<8x512xf32>,
    return
  }
  func.func @transform_0(%arg0: i32) -> (i32, i32) {
    %c0_i32 = arith.constant 0 : i32
    %c0_i32_0 = arith.constant 0 : i32
    return %arg0, %c0_i32 : i32, i32
  }
  func.func @transform_1(%arg0: i32) -> (i32, i32) {
    %c0_i32 = arith.constant 0 : i32
    %c0_i32_0 = arith.constant 0 : i32
    return %arg0, %c0_i32 : i32, i32
  }
  func.func @transform_2(%arg0: i32) -> (i32, i32) {
    %c0_i32 = arith.constant 0 : i32
    %c0_i32_0 = arith.constant 0 : i32
    return %arg0, %c0_i32 : i32, i32
  }
}

</mosaic_0001>

<bundles_post_ra>
// kernel: tpu_custom_call.1
= control target key start
LH: loop header
LB: loop body
LE: loop exit
PB: predicated region body
PF: predicated region fallthrough
CT: control target
= control target key end

     0   :  { %7 = vsyncpa [#allocation3], 0  ;;  %s210_s0 = inlined_call_operand.hbm [shape: f32[8,512], index: 0, kind: input, shape index: {}]   ;;  %s211_s1 = inlined_call_operand.hbm [shape: f32[8,512], index: 1, kind: input, shape index: {}]   ;;  %s212_s2 = inlined_call_operand.hbm [shape: f32[8,512], index: 2, kind: output, shape index: {}]  }
   0x1   :  { %8 = vsyncpa [#allocation6], 0 }
   0x2   :  { %9 = vsyncpa [#allocation4], 0  ;;  %s156_s9 = smov [#allocation2]   ;;  %s157_s11 = smov [#allocation5]  }
   0x3   :  { %s16_s10 = sshll.u32 %s156_s9, 4  ;;  %s26_s12 = sshll.u32 %s157_s11, 4  ;;  %s17_s10 = int_to_ptr.vmem [resolvable:$true] %s16_s10  ;;  %s27_s12 = int_to_ptr.vmem [resolvable:$true] %s26_s12 }
   0x4   :  { %s84_s15 = scalar_lea.hbm %s210_s0, 512 }
   0x5   :  { %p85_p0 = scmp.ne.s32.totalorder %s210_s0, %s84_s15  ;;  %p88_p1 = scmp.lt.u32.totalorder %s84_s15, %s210_s0 }
   0x7   :  { %p90_p2 = pnand %p88_p1, %p85_p0 }
   0x9   :  { %93 = shalt.err (!%p90_p2)
}
   0xa   :  { %s94_s20 = scalar_lea.vmem %s17_s10, 512  ;;  %p99_p4 = scmp.lt.s32.totalorder %s17_s10, %s17_s10 }
   0xb   :  { %p95_p3 = scmp.ne.s32.totalorder %s17_s10, %s94_s20  ;;  %p100_p5 = scmp.lt.s32.totalorder %s94_s20, %s94_s20 }
   0xd   :  { %p101_p6 = por %p100_p5, %p99_p4 }
   0xf   :  { %p102_p7 = pnand %p101_p6, %p95_p3 }
  0x11   :  { %105 = shalt.err (!%p102_p7)
}
  0x12   :  { %19 = dma.hbm_to_vmem [thread:$0]  %s210_s0, 512, %s17_s10, [#allocation3]  }
  0x13   :  { %s106_s25 = scalar_lea.hbm %s211_s1, 512 }
  0x14   :  { %p107_p8 = scmp.ne.s32.totalorder %s211_s1, %s106_s25  ;;  %p110_p9 = scmp.lt.u32.totalorder %s106_s25, %s211_s1 }
  0x16   :  { %p112_p10 = pnand %p110_p9, %p107_p8 }
  0x18   :  { %115 = shalt.err (!%p112_p10)
}
  0x19   :  { %s116_s30 = scalar_lea.vmem %s27_s12, 512  ;;  %p121_p12 = scmp.lt.s32.totalorder %s27_s12, %s27_s12 }
  0x1a   :  { %p117_p11 = scmp.ne.s32.totalorder %s27_s12, %s116_s30  ;;  %p122_p13 = scmp.lt.s32.totalorder %s116_s30, %s116_s30 }
  0x1c   :  { %p123_p0 = por %p122_p13, %p121_p12 }
  0x1e   :  { %p124_p1 = pnand %p123_p0, %p117_p11 }
  0x20   :  { %127 = shalt.err (!%p124_p1)
}
  0x21   :  { %29 = dma.hbm_to_vmem [thread:$0]  %s211_s1, 512, %s27_s12, [#allocation6]  }
  0x22   :  { %150 = dma.done.wait [#allocation3], 512  }
  0x23   :  { %151 = vsyncadd [#allocation3], 4294966784 }
  0x24   :  { %152 = dma.done.wait [#allocation6], 512  }
  0x25   :  { %153 = vsyncadd [#allocation6], 4294966784  ;;  %v39_v0 = vld [vmem:[#allocation2] sm:$0xff]  ;;  %v40_v2 = vld [vmem:[#allocation2 + $0x8] sm:$0xff]  ;;  %s158_s4 = smov [#allocation7]  }
  0x26   :  { %v45_v1 = vld [vmem:[#allocation5] sm:$0xff]  ;;  %v46_v4 = vld [vmem:[#allocation5 + $0x8] sm:$0xff]  ;;  %v41_v5 = vld [vmem:[#allocation2 + $0x10] sm:$0xff]  ;;  %s71_s5 = sshll.u32 %s158_s4, 4  ;;  %s72_s5 = int_to_ptr.vmem [resolvable:$true] %s71_s5 }
  0x27   :  { %v49_v3 = vsub.f32 %v39_v0, %v45_v1  ;;  %v47_v6 = vld [vmem:[#allocation5 + $0x10] sm:$0xff]  ;;  %v50_v7 = vsub.f32 %v40_v2, %v46_v4  ;;  %v42_v9 = vld [vmem:[#allocation2 + $0x18] sm:$0xff]  ;;  %s128_s1 = scalar_lea.vmem %s72_s5, 512  ;;  %p133_p3 = scmp.lt.s32.totalorder %s72_s5, %s72_s5 }
  0x28   :  { %v51_v8 = vsub.f32 %v41_v5, %v47_v6  ;;  %v48_v10 = vld [vmem:[#allocation5 + $0x18] sm:$0xff]  ;;  %p129_p2 = scmp.ne.s32.totalorder %s72_s5, %s128_s1  ;;  %p134_p4 = scmp.lt.s32.totalorder %s128_s1, %s128_s1 }
  0x29   :  { %v53_v11 = vmul.f32 %v49_v3, %v49_v3  ;;  %v52_v12 = vsub.f32 %v42_v9, %v48_v10  ;;  %v54_v13 = vmul.f32 %v50_v7, %v50_v7 }
  0x2a   :  { %v55_v14 = vmul.f32 %v51_v8, %v51_v8  ;;  %p135_p5 = por %p134_p4, %p133_p3 }
  0x2b   :  { %61 = vst [vmem:[#allocation7] sm:$0xff] %v53_v11  ;;  %v56_v15 = vmul.f32 %v52_v12, %v52_v12  ;;  %62 = vst [vmem:[#allocation7 + $0x8] sm:$0xff] %v54_v13 }
  0x2c   :  { %63 = vst [vmem:[#allocation7 + $0x10] sm:$0xff] %v55_v14  ;;  %p136_p6 = pnand %p135_p5, %p129_p2 }
  0x2d   :  { %64 = vst [vmem:[#allocation7 + $0x18] sm:$0xff] %v56_v15 }
  0x2e   :  { %139 = shalt.err (!%p136_p6)
}
  0x2f   :  { %s140_s8 = scalar_lea.hbm %s212_s2, 512 }
  0x30   :  { %p141_p7 = scmp.ne.s32.totalorder %s212_s2, %s140_s8  ;;  %p144_p8 = scmp.lt.u32.totalorder %s140_s8, %s212_s2 }
  0x32   :  { %p146_p9 = pnand %p144_p8, %p141_p7 }
  0x34   :  { %149 = shalt.err (!%p146_p9)
}
  0x35   :  { %74 = dma.vmem_to_hbm [thread:$0]  %s72_s5, 512, %s212_s2, [#allocation4]  }
  0x36   :  { %154 = dma.done.wait [#allocation4], 512  }
  0x37   :  { %155 = vsyncadd [#allocation4], 4294966784 }
  0x38   :  { %78 = vsyncpa [#allocation3], 1 }
  0x39   :  { %79 = vsyncpa [#allocation6], 1 }
  0x3a   :  { %80 = vsyncpa [#allocation4], 1 }

</bundles_post_ra>
